<compile_context>
chip_gen: v6e
topology: v6e:2x2x1
jax: 0.10.0
libtpu: 0.0.40
codegen_flags: <defaults>
</compile_context>

<pallas_src>
import math
from functools import partial

import numpy as np
import jax
import jax.numpy as jnp
from jax.experimental import pallas as pl
from jax.experimental.pallas import tpu as pltpu


def _dwconv_kernel(x_ref, w_ref, b_ref, o_ref, *, shifts):
    """Depthwise conv on TN flattened images.

    x_ref: (TN, D)       D = token_h*token_w*C, one image per sublane row
    w_ref: (n_taps, D)   per-tap depthwise weights, tiled over (h, w),
                         with out-of-bounds lanes pre-zeroed
    b_ref: (1, D)        bias tiled over (h, w)
    o_ref: (TN, D)
    """
    x = x_ref[...].astype(jnp.float32)
    w = w_ref[...].astype(jnp.float32)
    # Bias-initialized accumulator (one fewer full-tile add).
    acc = jnp.broadcast_to(b_ref[...].astype(jnp.float32), x.shape)
    for i, sh in enumerate(shifts):
        # Lane rotation brings the (h+dh-1, w+dw-1, c) neighbor to lane j.
        # Wrapped / out-of-range lanes are multiplied by zeroed weights.
        xs = x if sh == 0 else pltpu.roll(x, shift=sh, axis=1)
        acc = acc + xs * w[i, :]
    o_ref[...] = acc.astype(o_ref.dtype)


def _pick_images_per_block(N, D, itemsize):
    """Largest TN that divides N, is sublane-friendly and fits the VMEM budget."""
    # Double-buffered input + output blocks ~= 4 * TN * D * itemsize bytes;
    # keep under ~16 MiB so we stay inside scoped VMEM on v5e/v6e/v7x.
    budget = max(1, (16 * 1024 * 1024) // (4 * D * itemsize))
    legal = [k for k in range(1, N + 1) if N % k == 0 and (k % 8 == 0 or k == N)]
    fits = [k for k in legal if k <= budget]
    if not fits:
        return min(legal)
    sub = [k for k in fits if k < N]  # prefer >=2 grid steps (v7x megacore)
    return max(sub) if sub else max(fits)


def pos_cnn_forward(x, weight, bias, block_h=16, block_w=4, ks=3):
    """JAX/Pallas equivalent of PosCNN.forward.

    x:      (B, L, C)          L = H*H
    weight: (C, 1, ks, ks)     PyTorch depthwise Conv2d weight (OIHW, I=1)
    bias:   (C,)
    """
    B, L, C = x.shape
    H = int(math.sqrt(L))
    th = H // block_h
    tw = H // block_w
    N = B * block_h * block_w
    pad = (ks - 1) // 2
    D = th * tw * C

    # (B, L, C) -> (N, th*tw*C): same memory order as the PyTorch view chain.
    x_flat = x.reshape(N, D)

    # Build per-tap tiled weights with boundary lanes zeroed (in-kernel halo).
    w_taps = jnp.transpose(weight[:, 0, :, :], (1, 2, 0))    # (ks, ks, C)
    h_pos = np.arange(D) // (tw * C)
    w_pos = (np.arange(D) // C) % tw
    tap_rows, shifts = [], []
    for dh in range(ks):
        for dw in range(ks):
            s, t = dh - pad, dw - pad
            valid = ((h_pos + s >= 0) & (h_pos + s < th) &
                     (w_pos + t >= 0) & (w_pos + t < tw))
            if not valid.any():
                continue                                     # tap sees only zero padding
            off = s * tw * C + t * C                         # lane offset of the neighbor
            shifts.append(int((-off) % D))
            tap_rows.append(jnp.tile(w_taps[dh, dw, :], th * tw) *
                            jnp.asarray(valid, dtype=weight.dtype))
    w_tiled = jnp.stack(tap_rows, axis=0)                    # (n_taps, D)
    b_tiled = jnp.tile(bias, th * tw).reshape(1, D)
    n_taps = len(shifts)

    TN = _pick_images_per_block(N, D, x.dtype.itemsize)
    grid = (N // TN,)

    cost = pl.CostEstimate(
        flops=2 * N * D * n_taps,
        transcendentals=0,
        bytes_accessed=(2 * N * D + (n_taps + 1) * D) * x.dtype.itemsize,
    )

    out = pl.pallas_call(
        partial(_dwconv_kernel, shifts=tuple(shifts)),
        out_shape=jax.ShapeDtypeStruct((N, D), x.dtype),
        grid=grid,
        in_specs=[
            pl.BlockSpec((TN, D), lambda g: (g, 0)),
            pl.BlockSpec((n_taps, D), lambda g: (0, 0)),
            pl.BlockSpec((1, D), lambda g: (0, 0)),
        ],
        out_specs=pl.BlockSpec((TN, D), lambda g: (g, 0)),
        compiler_params=pltpu.CompilerParams(dimension_semantics=("parallel",)),
        cost_estimate=cost,
    )(x_flat, w_tiled, b_tiled)

    return out.reshape(B, L, C)


def _reference_forward(x, weight, bias, block_h, block_w, ks=3):
    """Pure-jnp reference with identical semantics (for validation)."""
    B, L, C = x.shape
    H = int(math.sqrt(L))
    th, tw = H // block_h, H // block_w
    N = B * block_h * block_w
    pad = (ks - 1) // 2
    cnn = x.reshape(N, th, tw, C)
    xp = jnp.pad(cnn, ((0, 0), (pad, pad), (pad, pad), (0, 0)))
    w_hwc = jnp.transpose(weight[:, 0, :, :], (1, 2, 0))
    acc = jnp.zeros((N, th, tw, C), jnp.float32)
    for dh in range(ks):
        for dw in range(ks):
            acc = acc + xp[:, dh:dh + th, dw:dw + tw, :].astype(jnp.float32) * w_hwc[dh, dw, :]
    acc = acc + bias.reshape(1, 1, 1, C)
    return acc.astype(x.dtype).reshape(B, L, C)


if __name__ == "__main__":
    key = jax.random.PRNGKey(0)
    kx, kw, kb = jax.random.split(key, 3)

    # Small shapes consistent with the forward: B=2, C(embed_dim)=32, H=16 -> L=256.
    B, C, H = 2, 32, 16
    L = H * H
    x = jax.random.normal(kx, (B, L, C), dtype=jnp.float32)
    # Synthetic parameters matching nn.Conv2d(C, C, 3, 1, 1, groups=C).
    weight = jax.random.normal(kw, (C, 1, 3, 3), dtype=jnp.float32) * 0.1
    bias = jax.random.normal(kb, (C,), dtype=jnp.float32) * 0.1

    ok = True
    # Non-degenerate blocking (token_h=4, token_w=8) and the module default (1, 4).
    for (bh, bw) in [(4, 2), (16, 4)]:
        out = pos_cnn_forward(x, weight, bias, block_h=bh, block_w=bw)
        out = jax.block_until_ready(out)
        ref = _reference_forward(x, weight, bias, bh, bw)
        if not jnp.allclose(out, ref, atol=1e-5, rtol=1e-5):
            ok = False
            print(f"MISMATCH for block_h={bh}, block_w={bw}: "
                  f"max err {float(jnp.max(jnp.abs(out - ref)))}")

    if ok:
        print("KERNEL_OK")
</pallas_src>

<mosaic_0001>
module attributes {stable_mosaic.version = 11 : i64} {
  func.func @_dwconv_kernel(%arg0: i32, %arg1: memref<8x1024xf32, #tpu.memory_space<vmem>>, %arg2: memref<9x1024xf32, #tpu.memory_space<vmem>>, %arg3: memref<1x1024xf32, #tpu.memory_space<vmem>>, %arg4: memref<8x1024xf32, #tpu.memory_space<vmem>>) attributes {dimension_semantics = [#tpu.dimension_semantics<parallel>], iteration_bounds = array<i64: 2>, scalar_prefetch = 0 : i64, scratch_operands = 0 : i64, tpu.core_type = #tpu.core_type<tc>, window_params = [{transform_indices = @transform_0, window_bounds = array<i64: 8, 1024>}, {pipeline_mode = #tpu.pipeline_mode<synchronous>, transform_indices = @transform_1, window_bounds = array<i64: 9, 1024>}, {pipeline_mode = #tpu.pipeline_mode<synchronous>, transform_indices = @transform_2, window_bounds = array<i64: 1, 1024>}, {transform_indices = @transform_3, window_bounds = array<i64: 8, 1024>}]} {
    %c0 = arith.constant 0 : index
    %c0_0 = arith.constant 0 : index
    %0 = vector.load %arg1[%c0, %c0_0] : memref<8x1024xf32, #tpu.memory_space<vmem>>, vector<8x1024xf32>
    %c0_1 = arith.constant 0 : index
    %c0_2 = arith.constant 0 : index
    %1 = vector.load %arg2[%c0_1, %c0_2] : memref<9x1024xf32, #tpu.memory_space<vmem>>, vector<9x1024xf32>
    %c0_3 = arith.constant 0 : index
    %c0_4 = arith.constant 0 : index
    %2 = vector.load %arg3[%c0_3, %c0_4] : memref<1x1024xf32, #tpu.memory_space<vmem>>, vector<1x1024xf32>
    %3 = vector.shape_cast %2 : vector<1x1024xf32> to vector<1x1024xf32>
    %4 = vector.broadcast %3 : vector<1x1024xf32> to vector<8x1024xf32>
    %c288_i32 = arith.constant 288 : i32
    %5 = tpu.dynamic_rotate %0 by %c288_i32 dim 1 : vector<8x1024xf32>, i32 -> vector<8x1024xf32>
    %6 = vector.extract_strided_slice %1 {offsets = [0, 0], sizes = [1, 1024], strides = [1, 1]} : vector<9x1024xf32> to vector<1x1024xf32>
    %7 = vector.shape_cast %6 : vector<1x1024xf32> to vector<1024xf32>
    %8 = vector.shape_cast %7 : vector<1024xf32> to vector<1x1024xf32>
    %9 = vector.broadcast %8 : vector<1x1024xf32> to vector<8x1024xf32>
    %10 = arith.mulf %5, %9 : vector<8x1024xf32>
    %11 = arith.addf %4, %10 : vector<8x1024xf32>
    %c256_i32 = arith.constant 256 : i32
    %12 = tpu.dynamic_rotate %0 by %c256_i32 dim 1 : vector<8x1024xf32>, i32 -> vector<8x1024xf32>
    %13 = vector.extract_strided_slice %1 {offsets = [1, 0], sizes = [1, 1024], strides = [1, 1]} : vector<9x1024xf32> to vector<1x1024xf32>
    %14 = vector.shape_cast %13 : vector<1x1024xf32> to vector<1024xf32>
    %15 = vector.shape_cast %14 : vector<1024xf32> to vector<1x1024xf32>
    %16 = vector.broadcast %15 : vector<1x1024xf32> to vector<8x1024xf32>
    %17 = arith.mulf %12, %16 : vector<8x1024xf32>
    %18 = arith.addf %11, %17 : vector<8x1024xf32>
    %c224_i32 = arith.constant 224 : i32
    %19 = tpu.dynamic_rotate %0 by %c224_i32 dim 1 : vector<8x1024xf32>, i32 -> vector<8x1024xf32>
    %20 = vector.extract_strided_slice %1 {offsets = [2, 0], sizes = [1, 1024], strides = [1, 1]} : vector<9x1024xf32> to vector<1x1024xf32>
    %21 = vector.shape_cast %20 : vector<1x1024xf32> to vector<1024xf32>
    %22 = vector.shape_cast %21 : vector<1024xf32> to vector<1x1024xf32>
    %23 = vector.broadcast %22 : vector<1x1024xf32> to vector<8x1024xf32>
    %24 = arith.mulf %19, %23 : vector<8x1024xf32>
    %25 = arith.addf %18, %24 : vector<8x1024xf32>
    %c32_i32 = arith.constant 32 : i32
    %26 = tpu.dynamic_rotate %0 by %c32_i32 dim 1 : vector<8x1024xf32>, i32 -> vector<8x1024xf32>
    %27 = vector.extract_strided_slice %1 {offsets = [3, 0], sizes = [1, 1024], strides = [1, 1]} : vector<9x1024xf32> to vector<1x1024xf32>
    %28 = vector.shape_cast %27 : vector<1x1024xf32> to vector<1024xf32>
    %29 = vector.shape_cast %28 : vector<1024xf32> to vector<1x1024xf32>
    %30 = vector.broadcast %29 : vector<1x1024xf32> to vector<8x1024xf32>
    %31 = arith.mulf %26, %30 : vector<8x1024xf32>
    %32 = arith.addf %25, %31 : vector<8x1024xf32>
    %33 = vector.extract_strided_slice %1 {offsets = [4, 0], sizes = [1, 1024], strides = [1, 1]} : vector<9x1024xf32> to vector<1x1024xf32>
    %34 = vector.shape_cast %33 : vector<1x1024xf32> to vector<1024xf32>
    %35 = vector.shape_cast %34 : vector<1024xf32> to vector<1x1024xf32>
    %36 = vector.broadcast %35 : vector<1x1024xf32> to vector<8x1024xf32>
    %37 = arith.mulf %0, %36 : vector<8x1024xf32>
    %38 = arith.addf %32, %37 : vector<8x1024xf32>
    %c992_i32 = arith.constant 992 : i32
    %39 = tpu.dynamic_rotate %0 by %c992_i32 dim 1 : vector<8x1024xf32>, i32 -> vector<8x1024xf32>
    %40 = vector.extract_strided_slice %1 {offsets = [5, 0], sizes = [1, 1024], strides = [1, 1]} : vector<9x1024xf32> to vector<1x1024xf32>
    %41 = vector.shape_cast %40 : vector<1x1024xf32> to vector<1024xf32>
    %42 = vector.shape_cast %41 : vector<1024xf32> to vector<1x1024xf32>
    %43 = vector.broadcast %42 : vector<1x1024xf32> to vector<8x1024xf32>
    %44 = arith.mulf %39, %43 : vector<8x1024xf32>
    %45 = arith.addf %38, %44 : vector<8x1024xf32>
    %c800_i32 = arith.constant 800 : i32
    %46 = tpu.dynamic_rotate %0 by %c800_i32 dim 1 : vector<8x1024xf32>, i32 -> vector<8x1024xf32>
    %47 = vector.extract_strided_slice %1 {offsets = [6, 0], sizes = [1, 1024], strides = [1, 1]} : vector<9x1024xf32> to vector<1x1024xf32>
    %48 = vector.shape_cast %47 : vector<1x1024xf32> to vector<1024xf32>
    %49 = vector.shape_cast %48 : vector<1024xf32> to vector<1x1024xf32>
    %50 = vector.broadcast %49 : vector<1x1024xf32> to vector<8x1024xf32>
    %51 = arith.mulf %46, %50 : vector<8x1024xf32>
    %52 = arith.addf %45, %51 : vector<8x1024xf32>
    %c768_i32 = arith.constant 768 : i32
    %53 = tpu.dynamic_rotate %0 by %c768_i32 dim 1 : vector<8x1024xf32>, i32 -> vector<8x1024xf32>
    %54 = vector.extract_strided_slice %1 {offsets = [7, 0], sizes = [1, 1024], strides = [1, 1]} : vector<9x1024xf32> to vector<1x1024xf32>
    %55 = vector.shape_cast %54 : vector<1x1024xf32> to vector<1024xf32>
    %56 = vector.shape_cast %55 : vector<1024xf32> to vector<1x1024xf32>
    %57 = vector.broadcast %56 : vector<1x1024xf32> to vector<8x1024xf32>
    %58 = arith.mulf %53, %57 : vector<8x1024xf32>
    %59 = arith.addf %52, %58 : vector<8x1024xf32>
    %c736_i32 = arith.constant 736 : i32
    %60 = tpu.dynamic_rotate %0 by %c736_i32 dim 1 : vector<8x1024xf32>, i32 -> vector<8x1024xf32>
    %61 = vector.extract_strided_slice %1 {offsets = [8, 0], sizes = [1, 1024], strides = [1, 1]} : vector<9x1024xf32> to vector<1x1024xf32>
    %62 = vector.shape_cast %61 : vector<1x1024xf32> to vector<1024xf32>
    %63 = vector.shape_cast %62 : vector<1024xf32> to vector<1x1024xf32>
    %64 = vector.broadcast %63 : vector<1x1024xf32> to vector<8x1024xf32>
    %65 = arith.mulf %60, %64 : vector<8x1024xf32>
    %66 = arith.addf %59, %65 : vector<8x1024xf32>
    %c0_5 = arith.constant 0 : index
    %c0_6 = arith.constant 0 : index
    %67 = vector.load %arg4[%c0_5, %c0_6] : memref<8x1024xf32, #tpu.memory_space<vmem>>, vector<8x1024xf32>
    tpu.vector_store %arg4[%c0_5, %c0_6], %66 {strides = array<i32>} : memref<8x1024xf32, #tpu.memory_space<vmem>>, vector<8x1024xf32>,
    return
  }
  func.func @transform_0(%arg0: i32) -> (i32, i32) {
    %c0_i32 = arith.constant 0 : i32
    %c0_i32_0 = arith.constant 0 : i32
    return %arg0, %c0_i32 : i32, i32
  }
  func.func @transform_1(%arg0: i32) -> (i32, i32) {
    %c0_i32 = arith.constant 0 : i32
    %c0_i32_0 = arith.constant 0 : i32
    %c0_i32_1 = arith.constant 0 : i32
    return %c0_i32, %c0_i32_0 : i32, i32
  }
  func.func @transform_2(%arg0: i32) -> (i32, i32) {
    %c0_i32 = arith.constant 0 : i32
    %c0_i32_0 = arith.constant 0 : i32
    %c0_i32_1 = arith.constant 0 : i32
    return %c0_i32, %c0_i32_0 : i32, i32
  }
  func.func @transform_3(%arg0: i32) -> (i32, i32) {
    %c0_i32 = arith.constant 0 : i32
    %c0_i32_0 = arith.constant 0 : i32
    return %arg0, %c0_i32 : i32, i32
  }
}

</mosaic_0001>

<bundles_post_ra>
// kernel: tpu_custom_call.1
= control target key start
LH: loop header
LB: loop body
LE: loop exit
PB: predicated region body
PF: predicated region fallthrough
CT: control target
= control target key end

     0   :  { %8 = vsyncpa [#allocation3], 0  ;;  %s1876_s0 = inlined_call_operand.hbm [shape: f32[16,1024], index: 0, kind: input, shape index: {}]   ;;  %s1877_s1 = inlined_call_operand.hbm [shape: f32[9,1024], index: 1, kind: input, shape index: {}]   ;;  %s1878_s2 = inlined_call_operand.hbm [shape: f32[1,1024], index: 2, kind: input, shape index: {}]   ;;  %s1879_s3 = inlined_call_operand.hbm [shape: f32[16,1024], index: 3, kind: output, shape index: {}]  }
   0x1   :  { %10 = vsyncpa [#allocation3 + $0x1], 0 }
   0x2   :  { %11 = vsyncpa [#allocation6], 0 }
   0x3   :  { %12 = vsyncpa [#allocation4], 0 }
   0x4   :  { %14 = vsyncpa [#allocation4 + $0x1], 0  ;;  %s1153_s12 = smov 0   ;;  %s1155_s13 = smov 0  }
   0x5   :  { %s1157_s14 = smov 0   ;;  %s1159_s15 = smov 0  }
   0x6 LB: > { %s1174_s16 = sadd.s32 4294967295, %s1123_s15   ;;  %s876_s17 = sadd.s32 4294967294, %s1123_s15   ;;  %s1123_s15 = sphi %s1159_s15, %s1979_s15   ;;  %s1119_s14 = sphi %s1157_s14, %s1978_s14   ;;  %s1115_s13 = sphi %s1155_s13, %s1977_s13   ;;  %s1111_s12 = sphi %s1153_s12, %s1976_s12  }
   0x7   : > { %p40_p0 = scmp.ne.s32.totalorder %s1115_s13, %s1111_s12  ;;  %p1880_p1 = scmp.eq.s32.totalorder %s1174_s16, 0 }
   0x8   : > { %p112_p3 = scmp.eq.s32.totalorder %s876_s17, 1  ;;  %p877_p5 = scmp.ge.s32.totalorder %s1123_s15, 1 }
   0x9   : > { %p1183_p4 = por %p1880_p1, %p40_p0  ;;  %p119_p7 = scmp.lt.s32.totalorder %s1123_s15, 3 }
   0xa   : > { %p1188_p6 = por %p112_p3, %p40_p0  ;;  %s1125_s21 = smov [#allocation5]  }
   0xb   : > { %s1890_s18 = scalar_select %p1183_p4, 1, 0 }
   0xc   : > { %s1891_s19 = scalar_select %p1188_p6, 1, 0 }
   0xd   : > { %p1193_p8 = pnand %p877_p5, %p119_p7  ;;  %s131_s22 = sshll.u32 %s1125_s21, 4  ;;  %s132_s22 = int_to_ptr.vmem [resolvable:$true] %s131_s22 }
   0xe   : > { %s1126_s24 = smov [#allocation7]   ;;  %s986_s26 = scalar_lea.vmem %s132_s22, 2048 }
   0xf   : > { %s1892_s20 = scalar_select %p1193_p8, 1, 0 }
  0x10   : > { %p916_p9 = pneg %p1193_p8  ;;  %s145_s25 = sshll.u32 %s1126_s24, 4  ;;  %s146_s25 = int_to_ptr.vmem [resolvable:$true] %s145_s25 }
  0x11   : > { %p987_p13 = scmp.ne.s32.totalorder %s132_s22, %s986_s26  ;;  %p994_p5 = scmp.lt.s32.totalorder %s132_s22, %s132_s22 }
  0x12   : > { %p1202_p11 = pnand %p916_p9, %p1880_p1  ;;  %p995_p7 = scmp.lt.s32.totalorder %s986_s26, %s986_s26 }
  0x14   : > { %p977_p12 = pneg %p1202_p11  ;;  %p996_p10 = por %p995_p7, %p994_p5 }
  0x16   : > { %p989_p0 = pnand %p987_p13, %p977_p12 }
  0x18   : > { %p990_p3 = pneg %p989_p0 }
  0x1a   : > { %p997_p9 = pnand %p996_p10, %p990_p3 }
  0x1c   : > { %1000 = shalt.err (!%p997_p9)
}
  0x1d   : > { %s1127_s27 = smov 1024   ;;  %s1128_s28 = smov 64  }
  0x1e   : > { %919 = dma.hbm_to_vmem [thread:$0]  (!%p1202_p11), %s1877_s1, 2048, %s132_s22, [#allocation6], %s1127_s27, %s1127_s27, %s1128_s28  }
  0x1f   : > { %s1012_s4 = scalar_lea.vmem %s146_s25, 128  ;;  %p1020_p2 = scmp.lt.s32.totalorder %s146_s25, %s146_s25 }
  0x20   : > { %p1013_p1 = scmp.ne.s32.totalorder %s146_s25, %s1012_s4  ;;  %p1021_p6 = scmp.lt.s32.totalorder %s1012_s4, %s1012_s4 }
  0x22   : > { %p1015_p13 = pnand %p1013_p1, %p977_p12  ;;  %p1022_p5 = por %p1021_p6, %p1020_p2 }
  0x24   : > { %p1016_p0 = pneg %p1015_p13 }
  0x26   : > { %p1023_p10 = pnand %p1022_p5, %p1016_p0 }
  0x28   : > { %1026 = shalt.err (!%p1023_p10)
}
  0x29   : > { %922 = dma.hbm_to_vmem [thread:$0]  (!%p1202_p11), %s1878_s2, 128, %s146_s25, [#allocation6]  }
  0x2a   : > { %s1225_s7 = sadd.s32 1, %s1123_s15   ;;  %s27_s8 = sadd.s32 1, %s1119_s14 }
  0x2b   : > { %s24_s9 = ssub.s32 %s1123_s15, %s1225_s7  ;;  %p34_p1 = scmp.ne.s32.totalorder %s1119_s14, %s1115_s13 }
  0x2c   : > { %p25_p2 = scmp.eq.s32.totalorder %s24_s9, 0  ;;  %p35_p6 = scmp.eq.s32.totalorder %s1123_s15, 0 }
  0x2d   : > { %p1894_p12 = scmp.eq.s32.totalorder %s1174_s16, 1  ;;  %p933_p7 = scmp.lt.s32.totalorder %s1123_s15, 2 }
  0x2e   : > { %s1241_s11 = scalar_select %p25_p2, %s1119_s14, %s27_s8  }
  0x2f   : > { %p1235_p3 = por %p1894_p12, %p34_p1  ;;  %p36_p9 = por %p35_p6, %p34_p1 }
  0x30   : > { %s156_s17 = sand.u32 1, %s1119_s14   ;;  %s902_s22 = sshll.u32 %s1123_s15, 10 }
  0x31   : > { %s1895_s10 = scalar_select %p1235_p3, 1, 0 }
  0x32   : > { %s881_s21 = sshll.u32 %s156_s17, 6  ;;  %s1248_s25 = scalar_lea.hbm %s1876_s0, %s902_s22 }
  0x33   : > { %s160_s26 = scalar_lea.vmem [#allocation2], %s881_s21  ;;  %p1250_p11 = pnand %p933_p7, %p36_p9 }
  0x34   : > { %s168_s27 = sshll.u32 %s160_s26, 4  ;;  %s157_s29 = scalar_lea.sflag [#allocation3], %s156_s17  ;;  %s169_s27 = int_to_ptr.vmem [resolvable:$true] %s168_s27 }
  0x35   : > { %s1027_s30 = scalar_lea.hbm %s1248_s25, 1024  ;;  %p1029_p0 = pneg %p1250_p11 }
  0x36   : > { %p1028_p13 = scmp.ne.s32.totalorder %s1248_s25, %s1027_s30  ;;  %s1032_s6 = scalar_lea.hbm %s1876_s0, 2048 }
  0x37   : > { %p1033_p1 = scmp.lt.s32.totalorder %s1248_s25, %s1876_s0  ;;  %p1034_p2 = scmp.lt.s32.totalorder %s1032_s6, %s1027_s30 }
  0x38   : > { %p1030_p5 = pnand %p1029_p0, %p1028_p13 }
  0x39   : > { %p1035_p6 = por %p1034_p2, %p1033_p1 }
  0x3a   : > { %p1031_p10 = pneg %p1030_p5 }
  0x3c   : > { %p1036_p12 = pnand %p1035_p6, %p1031_p10 }
  0x3e   : > { %1039 = shalt.err (!%p1036_p12)
}
  0x3f   : > { %s1040_s21 = scalar_lea.vmem %s169_s27, 1024  ;;  %s1129_s17 = smov [#allocation2]  }
  0x40   : > { %p1041_p7 = scmp.ne.s32.totalorder %s169_s27, %s1040_s21  ;;  %s1045_s22 = sshll.u32 %s1129_s17, 4  ;;  %s1046_s22 = int_to_ptr.vmem [resolvable:$false] %s1045_s22 }
  0x41   : > { %s1047_s23 = scalar_lea.vmem %s1046_s22, 2048  ;;  %p1048_p13 = scmp.lt.s32.totalorder %s169_s27, %s1046_s22 }
  0x42   : > { %p1043_p9 = pnand %p1041_p7, %p1029_p0  ;;  %p1049_p5 = scmp.lt.s32.totalorder %s1047_s23, %s1040_s21 }
  0x44   : > { %p1044_p3 = pneg %p1043_p9  ;;  %p1050_p4 = por %p1049_p5, %p1048_p13 }
  0x46   : > { %p1051_p8 = pnand %p1050_p4, %p1044_p3 }
  0x48   : > { %1054 = shalt.err (!%p1051_p8)
}
  0x49   : > { %926 = dma.hbm_to_vmem [thread:$0]  (!%p1250_p11), %s1248_s25, 1024, %s169_s27, %s157_s29  }
  0x4a   : > { %p1897_p10 = scmp.ne.s32.totalorder %s1892_s20, 0 }
  0x4c   : > { %177 = sbr.rel (%p1897_p10) target bundleno = 274 (0x112), region = 32 }
  0x51   : > { %s1271_s24 = sand.u32 1, %s1115_s13   ;;  %p1898_p4 = scmp.ne.s32.totalorder %s1890_s18, 0 }
  0x52   : > { %s885_s26 = sshll.u32 %s1271_s24, 6  ;;  %s180_s30 = scalar_lea.sflag [#allocation3], %s1271_s24 }
  0x53   : > { %s183_s4 = scalar_lea.vmem [#allocation2], %s885_s26 }
  0x54   : > { %1098 = dma.done.wait (%p1898_p4), %s180_s30, 1024  }
  0x55   : > { %1100 = vsyncadd (%p1898_p4), %s180_s30, 4294966272  ;;  %p1899_p8 = scmp.eq.s32.totalorder %s1174_s16, 0 }
  0x57   : > { %1102 = dma.done.wait (%p1899_p8), [#allocation6], 2176   ;;  %p1900_p3 = pmov %p1899_p8 }
  0x58   : > { %v1285_v0 = vld [vmem:[%s183_s4 + $0x10] sm:$0xff]  ;;  %v1287_v1 = vld [vmem:[%s183_s4] sm:$0xff]  ;;  %s1130_s20 = smov 32   ;;  %v1291_v2 = vld [vmem:[%s183_s4 + $0x18] sm:$0xff]  ;;  %s1131_s18 = smov 96   ;;  %v240_v8 = vlaneseq }
  0x59   : > { %1104 = vsyncadd (%p1900_p3), [#allocation6], 4294965120  ;;  %284 = vrot.lane.b32.xlu1 %v1285_v0, %s1130_s20  ;;  %280 = vrot.lane.b32.xlu0 %v1287_v1, %s1130_s20  ;;  %v1293_v3 = vld [vmem:[%s183_s4 + $0x8] sm:$0xff]  ;;  %v1299_v5 = vld [vmem:[%s183_s4 + $0x20] sm:$0xff]  ;;  %s1773_s25 = scalar_lea.vmem [#allocation8], %s885_s26  ;;  %s903_s27 = sshll.u32 %s1174_s16, 10 }
  0x5a   : > { %1901 = vst [vmem:[#allocation12_spill] sm:$0xff] %v1293_v3  ;;  %v1297_v4 = vld [vmem:[%s183_s4 + $0x28] sm:$0xff]  ;;  %v1303_v6 = vld [vmem:[%s183_s4 + $0x38] sm:$0xff]  ;;  %v1305_v7 = vld [vmem:[%s183_s4 + $0x30] sm:$0xff]  ;;  %v241_v9 = vshrl.u32 %v240_v8, 7  ;;  %v1337_v20 = vand.u32 127, %v240_v8  ;;  %s1837_s6 = scalar_lea.hbm %s1879_s3, %s903_s27 }
  0x5b   : > { %v1319_v11 = vld [vmem:[#allocation5] sm:$0xff]  ;;  %v1325_v14 = vld [vmem:[#allocation5 + $0x8] sm:$0xff]  ;;  %v1331_v17 = vld [vmem:[#allocation5 + $0x38] sm:$0xff]  ;;  %s787_s28 = sshll.u32 %s1773_s25, 4  ;;  %s773_s8 = scalar_lea.sflag [#allocation4], %s1271_s24  ;;  %s788_s28 = int_to_ptr.vmem [resolvable:$true] %s787_s28 }
  0x5c   : > { %v1317_v10 = vsub.s32 7, %v241_v9  ;;  %v1321_v12 = vsub.s32 6, %v241_v9  ;;  %v1327_v15 = vsub.s32 3, %v241_v9  ;;  %v1333_v18 = vsub.s32 0, %v241_v9  ;;  %v1341_v22 = vld [vmem:[#allocation5 + $0x18] sm:$0xff]  ;;  %v1343_v23 = vld [vmem:[#allocation7] sm:$0xff] }
  0x5d   : > { %286 = vrot.lane.b32.xlu1 %v1291_v2, %s1130_s20  ;;  %282 = vrot.lane.b32.xlu0 %v1293_v3, %s1130_s20  ;;  %v1335_v19 = vsub.s32 5, %v241_v9  ;;  %v1339_v21 = vsub.s32 4, %v241_v9  ;;  %v1347_v25 = vsub.s32 2, %v241_v9  ;;  %v1351_v27 = vsub.s32 1, %v241_v9  ;;  %v1356_v29 = vld [vmem:[#allocation5 + $0x28] sm:$0xff]  ;;  %v1360_v31 = vld [vmem:[#allocation5 + $0x20] sm:$0xff] }
  0x5e   : > { %1902 = vst [vmem:[#allocation13_spill] sm:$0xff] %v1317_v10  ;;  %v671_v13 = vrot.slane %v1319_v11, %v1317_v10  ;;  %v675_v16 = vrot.slane %v1325_v14, %v1317_v10  ;;  %v1371_v36 = vld [vmem:[#allocation5 + $0x10] sm:$0xff]  ;;  %v322_v42 = vrot.slane %v1341_v22, %v1333_v18  ;;  %v330_v44 = vrot.slane %v1356_v29, %v1333_v18  ;;  %s1055_s9 = scalar_lea.vmem %s788_s28, 1024  ;;  %p1973_p0 = scmp.ne.s32.totalorder %s1895_s10, 0 }
  0x5f   : > { %v1375_v38 = vld [vmem:[#allocation5 + $0x30] sm:$0xff]  ;;  %v326_v47 = vrot.slane %v1360_v31, %v1333_v18  ;;  %v366_v59 = vrot.slane %v1371_v36, %v1351_v27  ;;  %v370_v63 = vrot.slane %v1341_v22, %v1351_v27  ;;  %vm298_vm0 = vcmp.lt.s32.totalorder %v1337_v20, 32  ;;  %p1056_p11 = scmp.ne.s32.totalorder %s788_s28, %s1055_s9  ;;  %s1132_s16 = smov [#allocation8]  }
  0x60   : > { %v1354_v28 = vmul.f32 %v671_v13, %v1285_v0  ;;  %v1367_v34 = vmul.f32 %v675_v16, %v1291_v2  ;;  %v374_v16 = vrot.slane %v1360_v31, %v1351_v27  ;;  %v535_v24 = vrot.slane %v1371_v36, %v1339_v21  ;;  %s1059_s21 = sshll.u32 %s1132_s16, 4  ;;  %s1060_s21 = int_to_ptr.vmem [resolvable:$false] %s1059_s21 }
  0x61   : > { %290 = vrot.lane.b32.xlu1 %v1297_v4, %s1130_s20  ;;  %288 = vrot.lane.b32.xlu0 %v1299_v5, %s1130_s20  ;;  %v378_v60 = vrot.slane %v1356_v29, %v1351_v27  ;;  %v1445_v9 = vmul.f32 %v366_v59, %v1287_v1  ;;  %v382_v58 = vrot.slane %v1375_v38, %v1351_v27  ;;  %vm419_vm1 = vcmp.lt.s32.totalorder %v1337_v20, 96  ;;  %p1057_p1 = pnand %p1056_p11, %p1973_p0  ;;  %s1061_s17 = scalar_lea.vmem %s1060_s21, 2048 }
  0x62   : > { %1903 = vst [vmem:[#allocation14_spill] sm:$0xff] %v1354_v28  ;;  %1904 = vst [vmem:[#allocation15_spill] sm:$0xff] %v1367_v34  ;;  %v1454_v61 = vmul.f32 %v370_v63, %v1293_v3  ;;  %v539_v59 = vrot.slane %v1341_v22, %v1339_v21  ;;  %v543_v13 = vrot.slane %v1360_v31, %v1339_v21  ;;  %p1062_p6 = scmp.lt.s32.totalorder %s788_s28, %s1060_s21  ;;  %p1063_p12 = scmp.lt.s32.totalorder %s1061_s17, %s1055_s9 }
  0x63   : > { %v1463_v26 = vmul.f32 %v374_v16, %v1285_v0  ;;  %v679_v50 = vrot.slane %v1371_v36, %v1317_v10  ;;  %v362_v63 = vrot.slane %v1325_v14, %v1351_v27  ;;  %v1472_v57 = vmul.f32 %v535_v24, %v1285_v0  ;;  %p1058_p2 = pneg %p1057_p1 }
  0x64   : > { %v1475_v33 = vmul.f32 %v378_v60, %v1291_v2  ;;  %v1482_v8 = vmul.f32 %v382_v58, %v1299_v5  ;;  %v358_v43 = vrot.slane %v1319_v11, %v1351_v27  ;;  %v1491_v54 = vmul.f32 %v539_v59, %v1291_v2  ;;  %p1064_p7 = por %p1063_p12, %p1062_p6 }
  0x65   : > { %294 = vrot.lane.b32.xlu1 %v1303_v6, %s1130_s20  ;;  %292 = vrot.lane.b32.xlu0 %v1305_v7, %s1130_s20  ;;  %v1494_v49 = vmul.f32 %v543_v13, %v1299_v5  ;;  %v1501_v16 = vmul.f32 %v679_v50, %v1299_v5  ;;  %v1504_v53 = vmul.f32 %v362_v63, %v1303_v6 }
  0x66   : > { %v531_v13 = vrot.slane %v1325_v14, %v1339_v21  ;;  %v551_v50 = vrot.slane %v1375_v38, %v1339_v21  ;;  %v1520_v63 = vmul.f32 %v358_v43, %v1305_v7  ;;  %v555_v37 = vrot.slane %v1331_v17, %v1339_v21  ;;  %p1065_p9 = pnand %p1064_p7, %p1058_p2 }
  0x67   : > { %v683_v58 = vrot.slane %v1341_v22, %v1317_v10  ;;  %v687_v39 = vrot.slane %v1360_v31, %v1317_v10  ;;  %v691_v48 = vrot.slane %v1356_v29, %v1317_v10  ;;  %v1952_v20 = vrot.slane %v1356_v29, %v1335_v19 }
  0x68   : > { %v1551_v46 = vmul.f32 %v531_v13, %v1293_v3  ;;  %v1554_v45 = vmul.f32 %v551_v50, %v1305_v7  ;;  %v1569_v32 = vmul.f32 %v555_v37, %v1303_v6 }
  0x69   : > { %405 = vrot.lane.b32.xlu1 %v1293_v3, %s1131_s18  ;;  %403 = vrot.lane.b32.xlu0 %v1287_v1, %s1131_s18  ;;  %v1572_v50 = vmul.f32 %v683_v58, %v1297_v4  ;;  %v1580_v41 = vmul.f32 %v687_v39, %v1305_v7  ;;  %v1590_v58 = vmul.f32 %v691_v48, %v1303_v6 }
  0x6a   : > { %1907 = vst [vmem:[#allocation18_spill] sm:$0xff] %v1569_v32  ;;  %v1912_v39 = vrot.slane %v1325_v14, %v1321_v12  ;;  %v1916_v48 = vrot.slane %v1343_v23, %v1327_v15 }
  0x6b   : > { %1909 = vst [vmem:[#allocation20_spill] sm:$0xff] %v1590_v58 }
  0x6d   : > { %409 = vrot.lane.b32.xlu1 %v1291_v2, %s1131_s18  ;;  %407 = vrot.lane.b32.xlu0 %v1285_v0, %s1131_s18  ;;  %v386_v0 = vrot.slane %v1331_v17, %v1351_v27  ;;  %v547_v2 = vrot.slane %v1356_v29, %v1339_v21 }
  0x6f   : > { %v1523_v52 = vmul.f32 %v386_v0, %v1297_v4  ;;  %v527_v0 = vrot.slane %v1319_v11, %v1339_v21  ;;  %v1544_v51 = vmul.f32 %v547_v2, %v1297_v4 }
  0x71   : > { %413 = vrot.lane.b32.xlu1 %v1297_v4, %s1131_s18  ;;  %411 = vrot.lane.b32.xlu0 %v1299_v5, %s1131_s18 }
  0x75   : > { %417 = vrot.lane.b32.xlu1 %v1303_v6, %s1131_s18  ;;  %415 = vrot.lane.b32.xlu0 %v1305_v7, %s1131_s18  ;;  %v1915_v6 = vrot.slane %v1371_v36, %v1333_v18 }
  0xcb   : > { %v285_v62 = vpop.permute.xlu1 %284  ;;  %v281_v35 = vpop.permute.xlu0 %280 }
  0xcf   : > { %v287_v24 = vpop.permute.xlu1 %286  ;;  %v283_v60 = vpop.permute.xlu0 %282 }
  0xd0   : > { %v1531_v59 = vsel %vm298_vm0, %v283_v60, %v285_v62  ;;  %v1535_v5 = vsel %vm298_vm0, %v281_v35, %v283_v60  ;;  %v303_v40 = vsel %vm298_vm0, %v285_v62, %v287_v24  ;;  %v695_v60 = vrot.slane %v1375_v38, %v1317_v10 }
  0xd1   : > { %1905 = vst [vmem:[#allocation16_spill] sm:$0xff] %v1531_v59  ;;  %1906 = vst [vmem:[#allocation17_spill] sm:$0xff] %v1535_v5  ;;  %v342_v2 = vmul.f32 %v322_v42, %v1535_v5  ;;  %v343_v13 = vmul.f32 %v326_v47, %v1531_v59  ;;  %v344_v62 = vmul.f32 %v330_v44, %v303_v40 }
  0xd2   : > { %v1583_v47 = vmul.f32 %v527_v0, %v1287_v1  ;;  %v1593_v44 = vmul.f32 %v695_v60, %v1287_v1  ;;  %v1601_v0 = vmul.f32 %v1912_v39, %v303_v40 }
  0xd3   : > { %v291_v55 = vpop.permute.xlu1 %290  ;;  %v289_v43 = vpop.permute.xlu0 %288  ;;  %v350_v60 = vadd.f32 %v342_v2, %v1916_v48  ;;  %v1921_v2 = vrot.slane %v1331_v17, %v1333_v18 }
  0xd4   : > { %v302_v56 = vsel %vm298_vm0, %v287_v24, %v289_v43  ;;  %1908 = vst [vmem:[#allocation19_spill] sm:$0xff] %v1583_v47  ;;  %v301_v37 = vsel %vm298_vm0, %v289_v43, %v291_v55  ;;  %1910 = vst [vmem:[#allocation21_spill] sm:$0xff] %v1593_v44  ;;  %v1911_v24 = vrot.slane %v1341_v22, %v1327_v15 }
  0xd5   : > { %1913 = vst [vmem:[#allocation22_spill] sm:$0xff] %v1601_v0  ;;  %v1914_v43 = vrot.slane %v1325_v14, %v1327_v15  ;;  %v346_v48 = vmul.f32 %v1921_v2, %v301_v37  ;;  %v1925_v2 = vrot.slane %v1371_v36, %v1321_v12  ;;  %v1930_v47 = vrot.slane %v1319_v11, %v1333_v18 }
  0xd6   : > { %v511_v7 = vmul.f32 %v1911_v24, %v303_v40  ;;  %v1917_v24 = vrot.slane %v1343_v23, %v1339_v21  ;;  %v1918_v40 = vrot.slane %v1371_v36, %v1327_v15  ;;  %v1922_v21 = vrot.slane %v1343_v23, %v1347_v25 }
  0xd7   : > { %v295_v30 = vpop.permute.xlu1 %294  ;;  %v293_v42 = vpop.permute.xlu0 %292  ;;  %v654_v0 = vmul.f32 %v1925_v2, %v302_v56 }
  0xd8   : > { %v306_v4 = vsel %vm298_vm0, %v295_v30, %v281_v35  ;;  %v1607_v35 = vmul.f32 %v1914_v43, %v1535_v5  ;;  %v351_v28 = vadd.f32 %v343_v13, %v1917_v24  ;;  %v510_v39 = vmul.f32 %v1918_v40, %v1531_v59 }
  0xd9   : > { %v341_v1 = vmul.f32 %v1915_v6, %v306_v4  ;;  %v1919_v43 = vrot.slane %v1375_v38, %v1333_v18  ;;  %v1920_v6 = vrot.slane %v1343_v23, %v1335_v19  ;;  %v300_v24 = vsel %vm298_vm0, %v291_v55, %v293_v42 }
  0xda   : > { %v1927_v55 = vrot.slane %v1341_v22, %v1321_v12  ;;  %v339_v59 = vmul.f32 %v1930_v47, %v300_v24  ;;  %v1933_v47 = vrot.slane %v1375_v38, %v1321_v12 }
  0xdb   : > { %v345_v34 = vmul.f32 %v1919_v43, %v302_v56  ;;  %v352_v5 = vadd.f32 %v344_v62, %v1920_v6  ;;  %v349_v13 = vadd.f32 %v341_v1, %v1922_v21  ;;  %v406_v40 = vpop.permute.xlu1 %405  ;;  %v404_v3 = vpop.permute.xlu0 %403  ;;  %v1923_v43 = vrot.slane %v1360_v31, %v1327_v15 }
  0xdc   : > { %v1924_v62 = vrot.slane %v1356_v29, %v1327_v15  ;;  %v1647_v1 = vsel %vm419_vm1, %v404_v3, %v406_v40  ;;  %v1652_v21 = vmul.f32 %v1927_v55, %v301_v37  ;;  %v399_v55 = vadd.f32 %v1463_v26, %v351_v28 }
  0xdd   : > { %v512_v44 = vmul.f32 %v1923_v43, %v302_v56  ;;  %1926 = vst [vmem:[#allocation23_spill] sm:$0xff] %v1647_v1  ;;  %v299_v43 = vsel %vm298_vm0, %v293_v42, %v295_v30  ;;  %v397_v58 = vadd.f32 %v1445_v9, %v349_v13  ;;  %v1929_v56 = vrot.slane %v1343_v23, %v1321_v12 }
  0xde   : > { %v513_v6 = vmul.f32 %v1924_v62, %v301_v37  ;;  %v1928_v62 = vrot.slane %v1371_v36, %v1347_v25  ;;  %v398_v37 = vadd.f32 %v1454_v61, %v350_v60  ;;  %v1931_v30 = vrot.slane %v1343_v23, %v1317_v10 }
  0xdf   : > { %v353_v2 = vadd.f32 %v345_v34, %v1929_v56  ;;  %v1932_v42 = vrot.slane %v1319_v11, %v1327_v15  ;;  %v408_v34 = vpop.permute.xlu0 %407  ;;  %v400_v56 = vadd.f32 %v1475_v33, %v352_v5  ;;  %v1681_v61 = vmul.f32 %v1933_v47, %v306_v4 }
  0xe0   : > { %v462_v32 = vmul.f32 %v1928_v62, %v1647_v1  ;;  %v354_v9 = vadd.f32 %v346_v48, %v1931_v30  ;;  %v410_v1 = vpop.permute.xlu1 %409  ;;  %v1935_v26 = vrot.slane %v1325_v14, %v1333_v18  ;;  %v1936_v33 = vrot.slane %v1375_v38, %v1327_v15 }
  0xe1   : > { %v1675_v13 = vmul.f32 %v1932_v42, %v306_v4  ;;  %1934 = vst [vmem:[#allocation24_spill] sm:$0xff] %v1681_v61  ;;  %v1688_v60 = vsel %vm419_vm1, %v408_v34, %v410_v1  ;;  %v1937_v4 = vrot.slane %v1341_v22, %v1347_v25  ;;  %v1938_v30 = vrot.slane %v1360_v31, %v1347_v25 }
  0xe2   : > { %v470_v62 = vadd.f32 %v462_v32, %v397_v58  ;;  %v340_v28 = vmul.f32 %v1935_v26, %v299_v43  ;;  %v1692_v32 = vsel %vm419_vm1, %v406_v40, %v408_v34  ;;  %v514_v5 = vmul.f32 %v1936_v33, %v300_v24 }
  0xe3   : > { %v463_v48 = vmul.f32 %v1937_v4, %v1692_v32  ;;  %v464_v42 = vmul.f32 %v1938_v30, %v1688_v60  ;;  %v1939_v47 = vrot.slane %v1343_v23, %v1333_v18  ;;  %v1940_v34 = vrot.slane %v1331_v17, %v1327_v15 }
  0xe4   : > { %v518_v58 = vadd.f32 %v510_v39, %v470_v62  ;;  %v1941_v39 = vrot.slane %v1360_v31, %v1321_v12  ;;  %v1942_v33 = vrot.slane %v1356_v29, %v1321_v12  ;;  %v1943_v18 = vrot.slane %v1371_v36, %v1335_v19  ;;  %v891_v36 = vld [vmem:[#allocation5 + $0x50] ss:$0 sm:$0xff] }
  0xe5   : > { %v347_v40 = vadd.f32 %v339_v59, %v1939_v47  ;;  %v1711_v26 = vmul.f32 %v1940_v34, %v299_v43  ;;  %v471_v10 = vadd.f32 %v463_v48, %v398_v37  ;;  %v472_v30 = vadd.f32 %v464_v42, %v399_v55  ;;  %v414_v59 = vpop.permute.xlu1 %413  ;;  %v412_v47 = vpop.permute.xlu0 %411 }
  0xe6   : > { %v656_v62 = vmul.f32 %v1941_v39, %v300_v24  ;;  %v1719_v4 = vmul.f32 %v1942_v33, %v299_v43  ;;  %v566_v61 = vadd.f32 %v1472_v57, %v518_v58  ;;  %v606_v15 = vmul.f32 %v1943_v18, %v1688_v60 }
  0xe7   : > { %v1944_v34 = vrot.slane %v1343_v23, %v1351_v27  ;;  %v401_v39 = vadd.f32 %v1482_v8, %v353_v2  ;;  %v422_v43 = vsel %vm419_vm1, %v412_v47, %v414_v59  ;;  %v1734_v37 = vsel %vm419_vm1, %v410_v1, %v412_v47 }
  0xe8   : > { %v519_v57 = vadd.f32 %v511_v7, %v471_v10  ;;  %v520_v55 = vadd.f32 %v512_v44, %v472_v30  ;;  %v614_v58 = vadd.f32 %v606_v15, %v566_v61  ;;  %v1945_v48 = vrot.slane %v1356_v29, %v1347_v25 }
  0xe9   : > { %v348_v24 = vadd.f32 %v340_v28, %v1944_v34  ;;  %v1946_v23 = vrot.slane %v1375_v38, %v1347_v25  ;;  %v1947_v8 = vrot.slane %v1341_v22, %v1335_v19  ;;  %v1948_v10 = vrot.slane %v1360_v31, %v1335_v19  ;;  %v418_v30 = vpop.permute.xlu1 %417  ;;  %v416_v18 = vpop.permute.xlu0 %415 }
  0xea   : > { %v465_v42 = vmul.f32 %v1945_v48, %v1734_v37  ;;  %v402_v7 = vadd.f32 %v1523_v52, %v354_v9  ;;  %v662_v1 = vadd.f32 %v654_v0, %v614_v58  ;;  %v567_v61 = vadd.f32 %v1491_v54, %v519_v57  ;;  %v892_v57 = vld [vmem:[#allocation5 + $0x58] ss:$0 sm:$0xff]  ;;  %v893_v58 = vld [vmem:[#allocation5 + $0x60] ss:$0 sm:$0xff] }
  0xeb   : > { %v466_v27 = vmul.f32 %v1946_v23, %v422_v43  ;;  %v607_v2 = vmul.f32 %v1947_v8, %v1734_v37  ;;  %v608_v44 = vmul.f32 %v1948_v10, %v422_v43  ;;  %v568_v28 = vadd.f32 %v1494_v49, %v520_v55  ;;  %v894_v10 = vld [vmem:[#allocation5 + $0x68] ss:$0 sm:$0xff] }
  0xec   : > { %v473_v33 = vadd.f32 %v465_v42, %v400_v56  ;;  %v750_v47 = vmul.f32 %v891_v36, %v422_v43  ;;  %v427_v22 = vsel %vm419_vm1, %v418_v30, %v404_v3  ;;  %v420_v34 = vsel %vm419_vm1, %v416_v18, %v418_v30 }
  0xed   : > { %v474_v15 = vadd.f32 %v466_v27, %v401_v39  ;;  %v615_v48 = vadd.f32 %v607_v2, %v567_v61  ;;  %v616_v23 = vadd.f32 %v608_v44, %v568_v28  ;;  %v710_v52 = vadd.f32 %v1501_v16, %v662_v1  ;;  %v1955_v61 = vld [vmem:[#allocation16_spill] sm:$0xff] }
  0xee   : > { %v521_v31 = vadd.f32 %v513_v6, %v473_v33  ;;  %v396_v49 = vadd.f32 %v1504_v53, %v348_v24  ;;  %v1949_v0 = vrot.slane %v1325_v14, %v1347_v25  ;;  %v395_v56 = vadd.f32 %v1520_v63, %v347_v40  ;;  %v895_v33 = vld [vmem:[#allocation5 + $0x70] ss:$0 sm:$0xff] }
  0xef   : > { %v522_v54 = vadd.f32 %v514_v5, %v474_v15  ;;  %v663_v3 = vadd.f32 %v1652_v21, %v615_v48  ;;  %v664_v39 = vadd.f32 %v656_v62, %v616_v23  ;;  %v758_v43 = vadd.f32 %v750_v47, %v710_v52  ;;  %v1959_v47 = vld [vmem:[#allocation19_spill] sm:$0xff]  ;;  %v890_v23 = vld [vmem:[#allocation5 + $0x48] ss:$0 sm:$0xff] }
  0xf0   : > { %v461_v9 = vmul.f32 %v1949_v0, %v427_v22  ;;  %v569_v6 = vadd.f32 %v1544_v51, %v521_v31  ;;  %v421_v53 = vsel %vm419_vm1, %v414_v59, %v416_v18  ;;  %v1950_v5 = vrot.slane %v1319_v11, %v1347_v25  ;;  %v1957_v18 = vld [vmem:[#allocation23_spill] sm:$0xff]  ;;  %v1960_v31 = vld [vmem:[#allocation24_spill] sm:$0xff] }
  0xf1   : > { %v570_v16 = vadd.f32 %v1554_v45, %v522_v54  ;;  %766 = vst [vmem:[%s1773_s25 + $0x10] sm:$0xff] %v758_v43  ;;  %v711_v63 = vadd.f32 %v1572_v50, %v663_v3  ;;  %v712_v51 = vadd.f32 %v1580_v41, %v664_v39  ;;  %v1951_v21 = vrot.slane %v1331_v17, %v1347_v25  ;;  %v1963_v0 = vld [vmem:[#allocation20_spill] sm:$0xff]  ;;  %v1965_v43 = vld [vmem:[#allocation21_spill] sm:$0xff] }
  0xf2   : > { %v469_v55 = vadd.f32 %v461_v9, %v396_v49  ;;  %v460_v24 = vmul.f32 %v1950_v5, %v420_v34  ;;  %v609_v40 = vmul.f32 %v1952_v20, %v421_v53  ;;  %v1953_v36 = vrot.slane %v1375_v38, %v1335_v19  ;;  %v1962_v49 = vld [vmem:[#allocation18_spill] sm:$0xff]  ;;  %v889_v5 = vld [vmem:[#allocation5 + $0x40] ss:$0 sm:$0xff] }
  0xf3   : > { %v467_v45 = vmul.f32 %v1951_v21, %v421_v53  ;;  %v751_v27 = vmul.f32 %v892_v57, %v421_v53  ;;  %v1954_v41 = vrot.slane %v1325_v14, %v1335_v19  ;;  %v752_v2 = vmul.f32 %v893_v58, %v420_v34 }
  0xf4   : > { %v517_v62 = vadd.f32 %v1607_v35, %v469_v55  ;;  %v468_v59 = vadd.f32 %v460_v24, %v395_v56  ;;  %v610_v42 = vmul.f32 %v1953_v36, %v420_v34  ;;  %v617_v25 = vadd.f32 %v609_v40, %v569_v6  ;;  %v1964_v56 = vld [vmem:[#allocation22_spill] sm:$0xff]  ;;  %v1966_v6 = vld [vmem:[#allocation12_spill] sm:$0xff]  ;;  %v1967_v55 = vld [vmem:[#allocation13_spill] sm:$0xff] }
  0xf5   : > { %v605_v50 = vmul.f32 %v1954_v41, %v1692_v32  ;;  %v475_v8 = vadd.f32 %v467_v45, %v402_v7  ;;  %v759_v1 = vadd.f32 %v751_v27, %v711_v63  ;;  %v1956_v38 = vrot.slane %v1319_v11, %v1321_v12  ;;  %v1971_v45 = vld [vmem:[#allocation15_spill] sm:$0xff]  ;;  %v1972_v36 = vld [vmem:[#allocation14_spill] sm:$0xff] }
  0xf6   : > { %v565_v29 = vadd.f32 %v1551_v46, %v517_v62  ;;  %v516_v35 = vadd.f32 %v1675_v13, %v468_v59  ;;  %v618_v44 = vadd.f32 %v610_v42, %v570_v16  ;;  %v665_v7 = vadd.f32 %v1719_v4, %v617_v25 }
  0xf7   : > { %v652_v28 = vmul.f32 %v1956_v38, %v1955_v61  ;;  %v523_v14 = vadd.f32 %v1711_v26, %v475_v8  ;;  %v760_v30 = vadd.f32 %v752_v2, %v712_v51  ;;  %v1958_v46 = vrot.slane %v1319_v11, %v1335_v19  ;;  %767 = vst [vmem:[%s1773_s25 + $0x18] sm:$0xff] %v759_v1  ;;  %v896_v51 = vld [vmem:[#allocation5 + $0x78] ss:$0 sm:$0xff] }
  0xf8   : > { %v613_v13 = vadd.f32 %v605_v50, %v565_v29  ;;  %v564_v34 = vadd.f32 %v1959_v47, %v516_v35  ;;  %v666_v48 = vadd.f32 %v1960_v31, %v618_v44  ;;  %v1961_v52 = vrot.slane %v1331_v17, %v1335_v19 }
  0xf9   : > { %v604_v15 = vmul.f32 %v1958_v46, %v1957_v18  ;;  %v753_v26 = vmul.f32 %v894_v10, %v427_v22  ;;  %v571_v4 = vadd.f32 %v1962_v49, %v523_v14  ;;  %v713_v9 = vadd.f32 %v1963_v0, %v665_v7  ;;  %768 = vst [vmem:[%s1773_s25 + $0x20] sm:$0xff] %v760_v30 }
  0xfa   : > { %v611_v54 = vmul.f32 %v1961_v52, %v427_v22  ;;  %v754_v11 = vmul.f32 %v895_v33, %v1957_v18  ;;  %v661_v3 = vadd.f32 %v1964_v56, %v613_v13  ;;  %v714_v57 = vadd.f32 %v1965_v43, %v666_v48  ;;  %v1969_v22 = vld [vmem:[#allocation17_spill] sm:$0xff] }
  0xfb   : > { %v612_v39 = vadd.f32 %v604_v15, %v564_v34  ;;  %v1968_v58 = vrot.slane %v1331_v17, %v1967_v55  ;;  %v1970_v16 = vrot.slane %v1331_v17, %v1321_v12  ;;  %v761_v63 = vadd.f32 %v753_v26, %v713_v9 }
  0xfc   : > { %v619_v24 = vadd.f32 %v611_v54, %v571_v4  ;;  %v749_v21 = vmul.f32 %v890_v23, %v1734_v37  ;;  %v709_v20 = vadd.f32 %v1971_v45, %v661_v3  ;;  %v762_v62 = vadd.f32 %v754_v11, %v714_v57 }
  0xfd   : > { %v707_v19 = vmul.f32 %v1968_v58, %v1966_v6  ;;  %v659_v53 = vmul.f32 %v1970_v16, %v1969_v22  ;;  %v660_v40 = vadd.f32 %v652_v28, %v612_v39  ;;  %769 = vst [vmem:[%s1773_s25 + $0x28] sm:$0xff] %v761_v63  ;;  %v748_v12 = vmul.f32 %v889_v5, %v1688_v60 }
  0xfe   : > { %v757_v17 = vadd.f32 %v749_v21, %v709_v20  ;;  %770 = vst [vmem:[%s1773_s25 + $0x30] sm:$0xff] %v762_v62  ;;  %v755_v37 = vmul.f32 %v896_v51, %v1692_v32 }
  0xff   : > { %v667_v59 = vadd.f32 %v659_v53, %v619_v24  ;;  %v708_v42 = vadd.f32 %v1972_v36, %v660_v40 }
 0x100   : > { %765 = vst [vmem:[%s1773_s25 + $0x8] sm:$0xff] %v757_v17 }
 0x101   : > { %v715_v27 = vadd.f32 %v707_v19, %v667_v59  ;;  %v756_v41 = vadd.f32 %v748_v12, %v708_v42 }
 0x103   : > { %v763_v50 = vadd.f32 %v755_v37, %v715_v27  ;;  %764 = vst [vmem:[%s1773_s25] sm:$0xff] %v756_v41 }
 0x105   : > { %771 = vst [vmem:[%s1773_s25 + $0x38] sm:$0xff] %v763_v50 }
 0x106   : > { %1068 = shalt.err (!%p1065_p9)
}
 0x107   : > { %s1069_s22 = scalar_lea.hbm %s1837_s6, 1024  ;;  %s1073_s26 = scalar_lea.hbm %s1879_s3, 2048 }
 0x108   : > { %p1070_p13 = scmp.ne.s32.totalorder %s1837_s6, %s1069_s22  ;;  %p1074_p4 = scmp.lt.s32.totalorder %s1837_s6, %s1879_s3 }
 0x109   : > { %p1075_p8 = scmp.lt.s32.totalorder %s1073_s26, %s1069_s22 }
 0x10a   : > { %p1071_p5 = pnand %p1070_p13, %p1973_p0 }
 0x10b   : > { %p1076_p3 = por %p1075_p8, %p1074_p4 }
 0x10c   : > { %p1072_p10 = pneg %p1071_p5 }
 0x10e   : > { %p1077_p11 = pnand %p1076_p3, %p1072_p10 }
 0x110   : > { %1080 = shalt.err (!%p1077_p11)
}
 0x111   : > { %914 = dma.vmem_to_hbm [thread:$0]  (%p1973_p0), %s788_s28, 1024, %s1837_s6, %s773_s8  }
 0x112 PF: > { %s799_s20 = sand.u32 1, %s1111_s12   ;;  %p1974_p1 = scmp.ne.s32.totalorder %s1891_s19, 0 }
 0x113   : > { %p1975_p2 = scmp.ge.s32.totalorder %s1123_s15, 2  ;;  %s800_s18 = scalar_lea.sflag [#allocation4], %s799_s20 }
 0x115   : > { %p928_p6 = pnand %p1975_p2, %p1974_p1 }
 0x117   : > { %p929_p12 = pneg %p928_p6 }
 0x119   : > { %1106 = dma.done.wait (%p929_p12), %s800_s18, 1024  }
 0x11a   : > { %1108 = vsyncadd (%p929_p12), %s800_s18, 4294966272  ;;  %p17_p7 = scmp.ge.s32.totalorder %s1225_s7, 4   ;;  %s1976_s12 = smov %s1115_s13 }
 0x11b   : > { %s1977_s13 = smov %s1119_s14  ;;  %s1978_s14 = smov %s1241_s11 }
 0x11c   : > { %s1979_s15 = smov %s1225_s7  ;;  %19 = sbr.rel (!%p17_p7) target bundleno = 6 (0x6), region = 85 }
 0x121   :  { %805 = vsyncpa [#allocation3], 1 }
 0x122   :  { %807 = vsyncpa [#allocation3 + $0x1], 1 }
 0x123   :  { %808 = vsyncpa [#allocation6], 1 }
 0x124   :  { %809 = vsyncpa [#allocation4], 1 }
 0x125   :  { %811 = vsyncpa [#allocation4 + $0x1], 1 }

</bundles_post_ra>
